<compile_context>
chip_gen: v6e
topology: v6e:2x2x1
jax: 0.10.0
libtpu: 0.0.40
codegen_flags: <defaults>
</compile_context>

<pallas_src>
import functools

import jax
import jax.numpy as jnp
from jax.experimental import pallas as pl
from jax.experimental.pallas import tpu as pltpu


# ----------------------------- fused Pallas kernel -------------------------------
def _mlp2_kernel(x_ref, w1_ref, b1_ref, w2_ref, b2_ref, o_ref):
    # Feature-major:  x_ref (K, bm), w1_ref (H, K), w2_ref (E, H), o_ref (E, bm).
    # h and y keep M on the lane axis; both matmuls use the MXU with f32 accumulate,
    # bias add + ReLU run on the VPU.  The hidden activation never leaves VMEM/vregs.
    h = jnp.dot(w1_ref[...], x_ref[...], preferred_element_type=jnp.float32)   # (H, bm)
    h = jnp.maximum(h + b1_ref[...], 0.0)
    y = jnp.dot(w2_ref[...], h, preferred_element_type=jnp.float32)            # (E, bm)
    o_ref[...] = jnp.maximum(y + b2_ref[...], 0.0).astype(o_ref.dtype)


# ----------------------------- one-time param prep --------------------------------
def prepare_params(torch_params):
    """Hoisted out of the forward pass.  With the feature-major kernel layout the
    native PyTorch nn.Linear weight layout (out_features, in_features) is used
    directly; biases become (out_features, 1) columns."""
    return {
        "w1": jnp.asarray(torch_params["fc1_w"], jnp.float32),          # (hidden, in)
        "b1": jnp.asarray(torch_params["fc1_b"], jnp.float32)[:, None],  # (hidden, 1)
        "w2": jnp.asarray(torch_params["fc2_w"], jnp.float32),          # (embed, hidden)
        "b2": jnp.asarray(torch_params["fc2_b"], jnp.float32)[:, None],  # (embed, 1)
    }


# ----------------------------- forward pass ---------------------------------------
@functools.partial(jax.jit, static_argnames=("block_m", "out_dtype"))
def product_encoder(prod_features, params, *, block_m=4096, out_dtype=jnp.float32):
    """relu(fc2(relu(fc1(prod_features)))) — Linear acts on the last axis, any
    number of leading axes (like nn.Linear)."""
    x = jnp.asarray(prod_features, jnp.float32)
    lead = x.shape[:-1]
    K = x.shape[-1]
    M = 1
    for d in lead:
        M *= d

    w1, b1, w2, b2 = params["w1"], params["b1"], params["w2"], params["b2"]
    H, E = w1.shape[0], w2.shape[0]

    # Feature-major activations: (K, M) so M lives on the 128-lane axis.
    x_t = x.reshape(M, K).T                                    # (K, M)

    # Lane tiling: bm is a multiple of 128; pad M up to a multiple of bm and slice
    # the padded columns off afterwards (no partial-block masking needed).
    block_m = max(128, (block_m // 128) * 128)
    if M <= block_m:
        bm = max(128, ((M + 127) // 128) * 128)                # single lane-aligned block
    else:
        bm = block_m
    m_pad = pl.cdiv(M, bm) * bm
    if m_pad != M:
        x_t = jnp.pad(x_t, ((0, 0), (0, m_pad - M)))
    grid = (m_pad // bm,)

    cost = pl.CostEstimate(
        flops=2 * M * (K * H + H * E),
        transcendentals=0,
        bytes_accessed=4 * (M * K + H * K + H + E * H + E) + M * E * jnp.dtype(out_dtype).itemsize,
    )

    out = pl.pallas_call(
        _mlp2_kernel,
        out_shape=jax.ShapeDtypeStruct((E, m_pad), out_dtype),
        grid=grid,
        in_specs=[
            pl.BlockSpec((K, bm), lambda i: (0, i)),   # activations: tiled over lanes (M)
            pl.BlockSpec((H, K), lambda i: (0, 0)),    # fc1 weight: VMEM resident
            pl.BlockSpec((H, 1), lambda i: (0, 0)),    # fc1 bias (column)
            pl.BlockSpec((E, H), lambda i: (0, 0)),    # fc2 weight: VMEM resident
            pl.BlockSpec((E, 1), lambda i: (0, 0)),    # fc2 bias (column)
        ],
        out_specs=pl.BlockSpec((E, bm), lambda i: (0, i)),
        compiler_params=pltpu.CompilerParams(dimension_semantics=("parallel",)),
        cost_estimate=cost,
    )(x_t, w1, b1, w2, b2)

    # (E, m_pad) -> drop padding -> back to batch-major -> restore leading dims.
    return out[:, :M].T.reshape(lead + (E,))


# ----------------------------- reference (pure JAX) --------------------------------
def _reference(prod_features, torch_params):
    x = jnp.asarray(prod_features, jnp.float32)
    w1 = jnp.asarray(torch_params["fc1_w"], jnp.float32)
    b1 = jnp.asarray(torch_params["fc1_b"], jnp.float32)
    w2 = jnp.asarray(torch_params["fc2_w"], jnp.float32)
    b2 = jnp.asarray(torch_params["fc2_b"], jnp.float32)
    h = jax.nn.relu(x @ w1.T + b1)
    return jax.nn.relu(h @ w2.T + b2)


# ----------------------------- main -------------------------------------------------
if __name__ == "__main__":
    key = jax.random.PRNGKey(0)
    kx, kw1, kb1, kw2, kb2, kx2 = jax.random.split(key, 6)

    input_dim, hidden_dim, embed_dim = 3, 64, 32

    # Parameters in PyTorch layout (out_features, in_features), prepped once.
    torch_params = {
        "fc1_w": jax.random.normal(kw1, (hidden_dim, input_dim), jnp.float32) * 0.1,
        "fc1_b": jax.random.normal(kb1, (hidden_dim,), jnp.float32) * 0.1,
        "fc2_w": jax.random.normal(kw2, (embed_dim, hidden_dim), jnp.float32) * 0.1,
        "fc2_b": jax.random.normal(kb2, (embed_dim,), jnp.float32) * 0.1,
    }
    params = prepare_params(torch_params)

    # Test 1: the spec's toy shape — (batch=2, num_products=4, input_dim=3).
    x = jax.random.normal(kx, (2, 4, input_dim), jnp.float32)
    out = jax.block_until_ready(product_encoder(x, params))
    assert out.shape == (2, 4, embed_dim), out.shape
    ref = jax.block_until_ready(_reference(x, torch_params))
    err = float(jnp.max(jnp.abs(out - ref)))
    assert jnp.allclose(out, ref, atol=1e-3, rtol=1e-3), err

    # Test 2: ragged batch (M = 3000, not a multiple of the block) with a small
    # block_m so the cdiv grid / padding / multi-block parallel path is exercised.
    x2 = jax.random.normal(kx2, (3, 1000, input_dim), jnp.float32)
    out2 = jax.block_until_ready(product_encoder(x2, params, block_m=1024))
    assert out2.shape == (3, 1000, embed_dim), out2.shape
    ref2 = jax.block_until_ready(_reference(x2, torch_params))
    err2 = float(jnp.max(jnp.abs(out2 - ref2)))
    assert jnp.allclose(out2, ref2, atol=1e-3, rtol=1e-3), err2

    print("KERNEL_OK")
</pallas_src>

<mosaic_0001>
module attributes {stable_mosaic.version = 11 : i64} {
  func.func @_mlp2_kernel(%arg0: i32, %arg1: memref<3x128xf32, #tpu.memory_space<vmem>>, %arg2: memref<64x3xf32, #tpu.memory_space<vmem>>, %arg3: memref<64x1xf32, #tpu.memory_space<vmem>>, %arg4: memref<32x64xf32, #tpu.memory_space<vmem>>, %arg5: memref<32x1xf32, #tpu.memory_space<vmem>>, %arg6: memref<32x128xf32, #tpu.memory_space<vmem>>) attributes {dimension_semantics = [#tpu.dimension_semantics<parallel>], iteration_bounds = array<i64: 1>, scalar_prefetch = 0 : i64, scratch_operands = 0 : i64, tpu.core_type = #tpu.core_type<tc>, window_params = [{transform_indices = @transform_0, window_bounds = array<i64: 3, 128>}, {pipeline_mode = #tpu.pipeline_mode<synchronous>, transform_indices = @transform_1, window_bounds = array<i64: 64, 3>}, {pipeline_mode = #tpu.pipeline_mode<synchronous>, transform_indices = @transform_2, window_bounds = array<i64: 64, 1>}, {pipeline_mode = #tpu.pipeline_mode<synchronous>, transform_indices = @transform_3, window_bounds = array<i64: 32, 64>}, {pipeline_mode = #tpu.pipeline_mode<synchronous>, transform_indices = @transform_4, window_bounds = array<i64: 32, 1>}, {transform_indices = @transform_5, window_bounds = array<i64: 32, 128>}]} {
    %c0 = arith.constant 0 : index
    %c0_0 = arith.constant 0 : index
    %0 = vector.load %arg2[%c0, %c0_0] : memref<64x3xf32, #tpu.memory_space<vmem>>, vector<64x3xf32>
    %c0_1 = arith.constant 0 : index
    %c0_2 = arith.constant 0 : index
    %1 = vector.load %arg1[%c0_1, %c0_2] : memref<3x128xf32, #tpu.memory_space<vmem>>, vector<3x128xf32>
    %cst = arith.constant dense<0.000000e+00> : vector<64x128xf32>
    %2 = tpu.matmul %0, %1, %cst {dimension_numbers = #tpu.dot_dimension_numbers<[1], [0], [0], [1], [0, 0, 1, 1], [], []>} : vector<64x3xf32>, vector<3x128xf32>, vector<64x128xf32> -> vector<64x128xf32>
    %c0_3 = arith.constant 0 : index
    %c0_4 = arith.constant 0 : index
    %3 = vector.load %arg3[%c0_3, %c0_4] : memref<64x1xf32, #tpu.memory_space<vmem>>, vector<64x1xf32>
    %4 = vector.broadcast %3 : vector<64x1xf32> to vector<64x128xf32>
    %5 = arith.addf %2, %4 : vector<64x128xf32>
    %cst_5 = arith.constant 0.000000e+00 : f32
    %6 = vector.broadcast %cst_5 : f32 to vector<64x128xf32>
    %7 = arith.maximumf %5, %6 : vector<64x128xf32>
    %c0_6 = arith.constant 0 : index
    %c0_7 = arith.constant 0 : index
    %8 = vector.load %arg4[%c0_6, %c0_7] : memref<32x64xf32, #tpu.memory_space<vmem>>, vector<32x64xf32>
    %cst_8 = arith.constant dense<0.000000e+00> : vector<32x128xf32>
    %9 = tpu.matmul %8, %7, %cst_8 {dimension_numbers = #tpu.dot_dimension_numbers<[1], [0], [0], [1], [0, 0, 1, 1], [], []>} : vector<32x64xf32>, vector<64x128xf32>, vector<32x128xf32> -> vector<32x128xf32>
    %c0_9 = arith.constant 0 : index
    %c0_10 = arith.constant 0 : index
    %10 = vector.load %arg5[%c0_9, %c0_10] : memref<32x1xf32, #tpu.memory_space<vmem>>, vector<32x1xf32>
    %11 = vector.broadcast %10 : vector<32x1xf32> to vector<32x128xf32>
    %12 = arith.addf %9, %11 : vector<32x128xf32>
    %cst_11 = arith.constant 0.000000e+00 : f32
    %13 = vector.broadcast %cst_11 : f32 to vector<32x128xf32>
    %14 = arith.maximumf %12, %13 : vector<32x128xf32>
    %c0_12 = arith.constant 0 : index
    %c0_13 = arith.constant 0 : index
    %15 = vector.load %arg6[%c0_12, %c0_13] : memref<32x128xf32, #tpu.memory_space<vmem>>, vector<32x128xf32>
    tpu.vector_store %arg6[%c0_12, %c0_13], %14 {strides = array<i32>} : memref<32x128xf32, #tpu.memory_space<vmem>>, vector<32x128xf32>,
    return
  }
  func.func @transform_0(%arg0: i32) -> (i32, i32) {
    %c0_i32 = arith.constant 0 : i32
    %c0_i32_0 = arith.constant 0 : i32
    return %c0_i32, %arg0 : i32, i32
  }
  func.func @transform_1(%arg0: i32) -> (i32, i32) {
    %c0_i32 = arith.constant 0 : i32
    %c0_i32_0 = arith.constant 0 : i32
    %c0_i32_1 = arith.constant 0 : i32
    return %c0_i32, %c0_i32_0 : i32, i32
  }
  func.func @transform_2(%arg0: i32) -> (i32, i32) {
    %c0_i32 = arith.constant 0 : i32
    %c0_i32_0 = arith.constant 0 : i32
    %c0_i32_1 = arith.constant 0 : i32
    return %c0_i32, %c0_i32_0 : i32, i32
  }
  func.func @transform_3(%arg0: i32) -> (i32, i32) {
    %c0_i32 = arith.constant 0 : i32
    %c0_i32_0 = arith.constant 0 : i32
    %c0_i32_1 = arith.constant 0 : i32
    return %c0_i32, %c0_i32_0 : i32, i32
  }
  func.func @transform_4(%arg0: i32) -> (i32, i32) {
    %c0_i32 = arith.constant 0 : i32
    %c0_i32_0 = arith.constant 0 : i32
    %c0_i32_1 = arith.constant 0 : i32
    return %c0_i32, %c0_i32_0 : i32, i32
  }
  func.func @transform_5(%arg0: i32) -> (i32, i32) {
    %c0_i32 = arith.constant 0 : i32
    %c0_i32_0 = arith.constant 0 : i32
    return %c0_i32, %arg0 : i32, i32
  }
}

</mosaic_0001>

<bundles_post_ra>
// kernel: product_encoder.1
= control target key start
LH: loop header
LB: loop body
LE: loop exit
PB: predicated region body
PF: predicated region fallthrough
CT: control target
= control target key end

     0   :  { %vm102_vm0 = vcmask 1042432   ;;  %vm77_vm1 = vcmask 23552   ;;  %v446_v3 = vmov 0   ;;  %vm247_vm2 = vcmask 523264   ;;  %s576_s0 = inlined_call_operand.vmem [shape: f32[3,128], index: 0, kind: input, shape index: {}]   ;;  %s577_s1 = inlined_call_operand.vmem [shape: f32[64,3], index: 1, kind: input, shape index: {}]   ;;  %s578_s2 = inlined_call_operand.vmem [shape: f32[64,1], index: 2, kind: input, shape index: {}]   ;;  %s579_s4 = inlined_call_operand.vmem [shape: f32[32,1], index: 4, kind: input, shape index: {}]   ;;  %s580_s3 = inlined_call_operand.vmem [shape: f32[32,64], index: 3, kind: input, shape index: {}]   ;;  %s581_s5 = inlined_call_operand.vmem [shape: f32[32,128], index: 5, kind: output, shape index: {}]  }
   0x1   :  { %v28_v0 = vld [vmem:[%s576_s0] sm:$0x7]  ;;  %v21_v2 = vld [vmem:[%s577_s1 + $0x8] sm:$0xff]  ;;  %444 = vset.pattern.permute.xlu0 %v446_v3  ;;  %445 = vset.pattern.permute.xlu1 %v446_v3  ;;  %v22_v4 = vld [vmem:[%s577_s1 + $0x10] sm:$0xff] }
   0x2   :  { %v20_v1 = vld [vmem:[%s577_s1] sm:$0xff]  ;;  %391 = vmatprep.subr.msk.mxu0 %vm102_vm0, %v28_v0  ;;  %v36_v5 = vld [vmem:[%s578_s2 + $0x38] sm:$0xff]  ;;  %v34_v6 = vld [vmem:[%s578_s2 + $0x28] sm:$0xff] }
   0x3   :  { %393 = vmatprep.mubr.msk.f32.mxu0 %vm77_vm1, %v20_v1  ;;  %392 = vmatpush3.msk.msra.mxu0 %vm102_vm0, %v28_v0  ;;  %v23_v7 = vld [vmem:[%s577_s1 + $0x18] sm:$0xff]  ;;  %v24_v8 = vld [vmem:[%s577_s1 + $0x20] sm:$0xff]  ;;  %v35_v9 = vld [vmem:[%s578_s2 + $0x30] sm:$0xff] }
   0x4   :  { %394 = vmatmul.mubr.msk.f32.vlgmr.msra.gmra.mxu0 %vm77_vm1, %v21_v2  ;;  %74 = vperm.xlu0 %444, %v36_v5   ;;  %v33_v10 = vld [vmem:[%s578_s2 + $0x20] sm:$0xff]  ;;  %v25_v11 = vld [vmem:[%s577_s1 + $0x28] sm:$0xff]  ;;  %v26_v12 = vld [vmem:[%s577_s1 + $0x30] sm:$0xff] }
   0x5   :  { %396 = vmatprep.mubr.msk.f32.mxu0 %vm77_vm1, %v22_v4  ;;  %64 = vperm.xlu1 %445, %v34_v6   ;;  %v32_v13 = vld [vmem:[%s578_s2 + $0x18] sm:$0xff]  ;;  %v31_v14 = vld [vmem:[%s578_s2 + $0x10] sm:$0xff]  ;;  %v30_v16 = vld [vmem:[%s578_s2 + $0x8] sm:$0xff] }
   0x6   :  { %v27_v15 = vld [vmem:[%s577_s1 + $0x38] sm:$0xff]  ;;  %v29_v17 = vld [vmem:[%s578_s2] sm:$0xff]  ;;  %v224_v19 = vld [vmem:[%s579_s4 + $0x8] sm:$0xff] }
   0x7   :  { %v223_v18 = vld [vmem:[%s579_s4] sm:$0xff]  ;;  %v225_v20 = vld [vmem:[%s579_s4 + $0x10] sm:$0xff]  ;;  %v226_v21 = vld [vmem:[%s579_s4 + $0x18] sm:$0xff] }
   0x8   :  { %397 = vmatmul.mubr.msk.f32.gmra.mxu0 %vm77_vm1, %v23_v7  ;;  %69 = vperm.xlu0 %444, %v35_v9   ;;  %v219_v22 = vld [vmem:[%s580_s3] sm:$0xff]  ;;  %v221_v23 = vld [vmem:[%s580_s3 + $0x10] sm:$0xff]  ;;  %v220_v56 = vld [vmem:[%s580_s3 + $0x8] sm:$0xff] }
   0x9   :  { %399 = vmatprep.mubr.msk.f32.mxu0 %vm77_vm1, %v24_v8  ;;  %59 = vperm.xlu1 %445, %v33_v10   ;;  %v222_v57 = vld [vmem:[%s580_s3 + $0x18] sm:$0xff] }
   0xa   :  { %424 = vmatprep.mubr.msk.f32.mxu1 %vm247_vm2, %v221_v23 }
   0xc   :  { %400 = vmatmul.mubr.msk.f32.gmra.mxu0 %vm77_vm1, %v25_v11  ;;  %54 = vperm.xlu0 %444, %v32_v13  }
   0xd   :  { %402 = vmatprep.mubr.msk.f32.mxu0 %vm77_vm1, %v26_v12  ;;  %49 = vperm.xlu1 %445, %v31_v14  }
  0x10   :  { %403 = vmatmul.mubr.msk.f32.gmra.mxu0 %vm77_vm1, %v27_v15  ;;  %44 = vperm.xlu0 %444, %v30_v16  }
  0x11   :  { %39 = vperm.xlu1 %445, %v29_v17   ;;  %421 = vmatprep.mubr.msk.f32.mxu0 %vm247_vm2, %v219_v22 }
  0x14   :  { %229 = vperm.xlu0 %444, %v223_v18  }
  0x15   :  { %234 = vperm.xlu1 %445, %v224_v19  }
  0x18   :  { %239 = vperm.xlu0 %444, %v225_v20  }
  0x19   :  { %244 = vperm.xlu1 %445, %v226_v21  }
  0x7f   :  { %v75_v25 = vpop.permute.xlu0 %74 }
  0x80   :  { %v65_v27 = vpop.permute.xlu1 %64 }
  0x83   :  { %v70_v30 = vpop.permute.xlu0 %69 }
  0x84   :  { %v60_v32 = vpop.permute.xlu1 %59 }
  0x87   :  { %v55_v36 = vpop.permute.xlu0 %54 }
  0x88   :  { %v50_v41 = vpop.permute.xlu1 %49 }
  0x8b   :  { %v45_v46 = vpop.permute.xlu0 %44 }
  0x8c   :  { %v40_v49 = vpop.permute.xlu1 %39 }
  0x8f   :  { %v230_v59 = vpop.permute.xlu0 %229 }
  0x90   :  { %v235_v58 = vpop.permute.xlu1 %234 }
  0x93   :  { %v240_v63 = vpop.permute.xlu0 %239 }
  0x94   :  { %v245_v60 = vpop.permute.xlu1 %244 }
  0xc4   :  { %v395_v24 = vpop.f32.mrf.mxu0 }
  0xc5   :  { %v178_v50 = vadd.f32 %v395_v24, %v45_v46 }
  0xc6   :  { %v172_v26 = vpop.f32.mrf.mxu0 }
  0xc7   :  { %v173_v52 = vadd.f32 %v172_v26, %v40_v49  ;;  %v212_v54 = vmax.f32 %v178_v50, 0.0 }
  0xc8   :  { %v398_v28 = vpop.f32.mrf.mxu0 }
  0xc9   :  { %v188_v44 = vadd.f32 %v398_v28, %v55_v36  ;;  %v211_v55 = vmax.f32 %v173_v52, 0.0 }
  0xca   :  { %v182_v29 = vpop.f32.mrf.mxu0 }
  0xcb   :  { %v183_v47 = vadd.f32 %v182_v29, %v50_v41  ;;  %v214_v51 = vmax.f32 %v188_v44, 0.0 }
  0xcc   :  { %v401_v31 = vpop.f32.mrf.mxu0 }
  0xcd   :  { %v198_v38 = vadd.f32 %v401_v31, %v65_v27  ;;  %v213_v53 = vmax.f32 %v183_v47, 0.0 }
  0xce   :  { %v192_v33 = vpop.f32.mrf.mxu0 }
  0xcf   :  { %v193_v42 = vadd.f32 %v192_v33, %v60_v32  ;;  %v216_v45 = vmax.f32 %v198_v38, 0.0 }
  0xd0   :  { %v404_v34 = vpop.f32.mrf.mxu0 }
  0xd1   :  { %v208_v35 = vadd.f32 %v404_v34, %v75_v25  ;;  %v215_v48 = vmax.f32 %v193_v42, 0.0 }
  0xd2   :  { %v202_v37 = vpop.f32.mrf.mxu0 }
  0xd3   :  { %v218_v39 = vmax.f32 %v208_v35, 0.0  ;;  %v203_v40 = vadd.f32 %v202_v37, %v70_v30 }
  0xd5   :  { %v217_v43 = vmax.f32 %v203_v40, 0.0  ;;  %405 = vmatprep.subr.mxu0 %v218_v39  ;;  %427 = vmatprep.subr.mxu1 %v218_v39 }
  0xd6   :  { %406 = vmatpush3.msra.mxu0 %v218_v39  ;;  %435 = vmatpush3.msra.mxu1 %v218_v39 }
  0xd7   :  { %407 = vmatprep.subr.mxu0 %v217_v43  ;;  %428 = vmatprep.subr.mxu1 %v217_v43 }
  0xd8   :  { %408 = vmatpush3.msra.mxu0 %v217_v43  ;;  %436 = vmatpush3.msra.mxu1 %v217_v43 }
  0xd9   :  { %409 = vmatprep.subr.mxu0 %v216_v45  ;;  %429 = vmatprep.subr.mxu1 %v216_v45 }
  0xda   :  { %410 = vmatpush3.msra.mxu0 %v216_v45  ;;  %437 = vmatpush3.msra.mxu1 %v216_v45 }
  0xdb   :  { %411 = vmatprep.subr.mxu0 %v215_v48  ;;  %430 = vmatprep.subr.mxu1 %v215_v48 }
  0xdc   :  { %412 = vmatpush3.msra.mxu0 %v215_v48  ;;  %438 = vmatpush3.msra.mxu1 %v215_v48 }
  0xdd   :  { %413 = vmatprep.subr.mxu0 %v214_v51  ;;  %431 = vmatprep.subr.mxu1 %v214_v51 }
  0xde   :  { %414 = vmatpush3.msra.mxu0 %v214_v51  ;;  %439 = vmatpush3.msra.mxu1 %v214_v51 }
  0xdf   :  { %415 = vmatprep.subr.mxu0 %v213_v53  ;;  %432 = vmatprep.subr.mxu1 %v213_v53 }
  0xe0   :  { %416 = vmatpush3.msra.mxu0 %v213_v53  ;;  %440 = vmatpush3.msra.mxu1 %v213_v53 }
  0xe1   :  { %417 = vmatprep.subr.mxu0 %v212_v54  ;;  %433 = vmatprep.subr.mxu1 %v212_v54 }
  0xe2   :  { %418 = vmatpush3.msra.mxu0 %v212_v54  ;;  %441 = vmatpush3.msra.mxu1 %v212_v54 }
  0xe3   :  { %419 = vmatprep.subr.mxu0 %v211_v55  ;;  %434 = vmatprep.subr.mxu1 %v211_v55 }
  0xe4   :  { %420 = vmatpush3.msra.mxu0 %v211_v55  ;;  %442 = vmatpush3.msra.mxu1 %v211_v55 }
  0xe5   :  { %422 = vmatmul.mubr.msk.f32.vlgmr.msra.gmra.mxu0 %vm247_vm2, %v220_v56  ;;  %425 = vmatmul.mubr.msk.f32.vlgmr.msra.gmra.mxu1 %vm247_vm2, %v222_v57 }
 0x1a5   :  { %v423_v61 = vpop.f32.mrf.mxu0  ;;  %v426_v62 = vpop.f32.mrf.mxu1 }
 0x1a6   :  { %v332_v0 = vadd.f32 %v423_v61, %v235_v58  ;;  %v342_v1 = vadd.f32 %v426_v62, %v245_v60 }
 0x1a7   :  { %v326_v2 = vpop.f32.mrf.mxu0  ;;  %v336_v3 = vpop.f32.mrf.mxu1 }
 0x1a8   :  { %v346_v4 = vmax.f32 %v332_v0, 0.0  ;;  %v348_v5 = vmax.f32 %v342_v1, 0.0  ;;  %v327_v6 = vadd.f32 %v326_v2, %v230_v59  ;;  %v337_v7 = vadd.f32 %v336_v3, %v240_v63 }
 0x1aa   :  { %350 = vst [vmem:[%s581_s5 + $0x8] sm:$0xff] %v346_v4  ;;  %352 = vst [vmem:[%s581_s5 + $0x18] sm:$0xff] %v348_v5  ;;  %v345_v8 = vmax.f32 %v327_v6, 0.0  ;;  %v347_v9 = vmax.f32 %v337_v7, 0.0 }
 0x1ac   :  { %349 = vst [vmem:[%s581_s5] sm:$0xff] %v345_v8  ;;  %351 = vst [vmem:[%s581_s5 + $0x10] sm:$0xff] %v347_v9 }

</bundles_post_ra>
